<compile_context>
chip_gen: v5e
topology: v5e:2x2
jax: 0.10.0
libtpu: 0.0.40
codegen_flags: <defaults>
</compile_context>

<pallas_src>
import jax
import jax.numpy as jnp
from jax.experimental import pallas as pl
from jax.experimental.pallas import tpu as pltpu

LANE = 128     # vreg lane width
SUBLANE = 8    # f32 sublane count


def _round_up(x, m):
    return (x + m - 1) // m * m


def decoder_kernel(x_ref, w1_ref, b1_ref, w2_ref, b2_ref, out_ref):
    # x_ref: (TB, Z) streamed tile; weights/biases: full, VMEM-resident.
    # Biases are kept f32 so every elementwise op (bias add, relu, sigmoid)
    # runs in f32 regardless of weight storage dtype (v5e-friendly).
    x = x_ref[...].astype(w1_ref.dtype)

    # Linear 1 + ReLU  (MXU matmul, f32 accumulate; VPU bias/relu)
    h = jnp.dot(x, w1_ref[...], preferred_element_type=jnp.float32) + b1_ref[...]
    h = jnp.maximum(h, 0.0)

    # Linear 2 + sigmoid (EUP handles the exp inside sigmoid)
    logits = (jnp.dot(h.astype(w2_ref.dtype), w2_ref[...],
                      preferred_element_type=jnp.float32) + b2_ref[...])
    out_ref[...] = jax.nn.sigmoid(logits).astype(out_ref.dtype)


def prepare_decoder_params(w1, b1, w2, b2, *, param_dtype=None):
    """One-time parameter prep (do NOT repeat per forward call).

    PyTorch nn.Linear stores W as (out, in); transpose to (in, out) so the
    kernel runs plain row-major MXU matmuls. The hidden and output feature
    dims are zero-padded to multiples of 128 (lane-dense intermediates and
    unmasked output stores). Optionally store the weight matrices in bf16
    (recommended on v6e/v7x); biases stay f32 so in-kernel elementwise math
    remains f32.

    Returns (w1_t, b1_2d, w2_t, b2_2d, out_dim).
    """
    hidden_dim = w1.shape[0]
    out_dim = w2.shape[0]
    h_pad = _round_up(max(hidden_dim, LANE), LANE)
    o_pad = _round_up(max(out_dim, LANE), LANE)

    w1_t = jnp.asarray(w1, jnp.float32).T          # (Z, H)
    w2_t = jnp.asarray(w2, jnp.float32).T          # (H, O)
    b1 = jnp.asarray(b1, jnp.float32)
    b2 = jnp.asarray(b2, jnp.float32)

    if h_pad != hidden_dim:                        # zero-pad hidden dim
        w1_t = jnp.pad(w1_t, ((0, 0), (0, h_pad - hidden_dim)))
        b1 = jnp.pad(b1, (0, h_pad - hidden_dim))
        w2_t = jnp.pad(w2_t, ((0, h_pad - hidden_dim), (0, 0)))
    if o_pad != out_dim:                           # zero-pad output dim
        w2_t = jnp.pad(w2_t, ((0, 0), (0, o_pad - out_dim)))
        b2 = jnp.pad(b2, (0, o_pad - out_dim))

    if param_dtype is not None:                    # e.g. jnp.bfloat16 on v6e/v7x
        w1_t = w1_t.astype(param_dtype)
        w2_t = w2_t.astype(param_dtype)

    return w1_t, b1.reshape(1, -1), w2_t, b2.reshape(1, -1), out_dim


def _default_vmem_budget():
    # ~96 MiB on 128-MiB VMEM parts (v5e/v6e), ~48 MiB on 64-MiB parts (v7x).
    try:
        phys = pltpu.get_tpu_info().vmem_capacity_bytes
    except Exception:
        phys = 64 * 1024 * 1024                    # safe fallback everywhere
    return (96 if phys >= 100 * 1024 * 1024 else 48) * 1024 * 1024


def decoder_forward(x, w1_t, b1_2d, w2_t, b2_2d, out_dim, *,
                    block_b=1024, out_dtype=None, vmem_limit_bytes=None,
                    return_padded=False):
    """x: (B, z_dim). Params from prepare_decoder_params.
       Returns (B, out_dim) (or the (B, O_pad) slab if return_padded)."""
    B, Z = x.shape
    assert Z == w1_t.shape[0]
    H_pad = w1_t.shape[1]
    O_pad = w2_t.shape[1]
    out_dtype = out_dtype or x.dtype
    if vmem_limit_bytes is None:
        vmem_limit_bytes = _default_vmem_budget()

    x_bytes = jnp.dtype(x.dtype).itemsize
    o_bytes = jnp.dtype(out_dtype).itemsize
    w_bytes = (w1_t.size * w1_t.dtype.itemsize + b1_2d.size * b1_2d.dtype.itemsize +
               w2_t.size * w2_t.dtype.itemsize + b2_2d.size * b2_2d.dtype.itemsize)

    # Batch tile: multiple of 8 sublanes, <= ~1024 rows (HBM roofline saturates
    # by then), at least 2 tiles so both v7x TensorCores get work, and small
    # enough that the double-buffered x/out stream + (conservatively 2x)
    # resident weights + the (TB,H)/(TB,O) f32 intermediates fit the budget
    # with ~25% headroom.
    tb = min(block_b, 1024, _round_up(B, SUBLANE))
    if B > SUBLANE:
        tb = min(tb, _round_up(pl.cdiv(B, 2), SUBLANE))
    tb = max(SUBLANE, _round_up(tb, SUBLANE))

    def vmem_need(t):
        stream = 2 * t * (Z * x_bytes + O_pad * o_bytes)   # double-buffered x/out
        temps = t * (H_pad + 2 * O_pad) * 4                # h, logits, sigmoid (f32)
        return 2 * w_bytes + stream + temps

    while tb > SUBLANE and vmem_need(tb) > (vmem_limit_bytes * 3) // 4:
        tb = max(SUBLANE, _round_up(tb // 2, SUBLANE))

    grid = (pl.cdiv(B, tb),)   # no host-side padding: partial last block is
                               # read padded / written masked by Pallas.

    def run(single_buffer_weights):
        # Resident weights: constant index_map; single-buffer them when the
        # JAX version supports pipeline_mode (halves footprint on v7x).
        resident = ({"pipeline_mode": pl.Buffered(1)}
                    if single_buffer_weights else {})
        grid_spec = pl.GridSpec(
            grid=grid,
            in_specs=[
                pl.BlockSpec((tb, Z), lambda i: (i, 0)),                 # x: streamed
                pl.BlockSpec(w1_t.shape, lambda i: (0, 0), **resident),  # W1: resident
                pl.BlockSpec(b1_2d.shape, lambda i: (0, 0), **resident), # b1: resident
                pl.BlockSpec(w2_t.shape, lambda i: (0, 0), **resident),  # W2: resident
                pl.BlockSpec(b2_2d.shape, lambda i: (0, 0), **resident), # b2: resident
            ],
            out_specs=pl.BlockSpec((tb, O_pad), lambda i: (i, 0)),
        )
        return pl.pallas_call(
            decoder_kernel,
            out_shape=jax.ShapeDtypeStruct((B, O_pad), out_dtype),
            grid_spec=grid_spec,
            compiler_params=pltpu.CompilerParams(
                dimension_semantics=("parallel",),   # batch tiles -> both TCs on v7x
                vmem_limit_bytes=vmem_limit_bytes,
            ),
        )(x, w1_t, b1_2d, w2_t, b2_2d)

    try:
        out = run(True)
    except Exception:
        out = run(False)   # pipeline_mode unsupported -> default double-buffering

    if return_padded or O_pad == out_dim:
        return out                      # lane-dense output, no extra HBM pass
    return out[:, :out_dim]             # only needed when out_dim % 128 != 0


def reference_forward(x, w1, b1, w2, b2):
    # Pure-JAX reference using the PyTorch (out, in) weight layout.
    h = jax.nn.relu(x @ w1.T + b1)
    return jax.nn.sigmoid(h @ w2.T + b2)


if __name__ == "__main__":
    key = jax.random.PRNGKey(0)

    def make_case(key, Z, H, O, B):
        kx, kw1, kb1, kw2, kb2 = jax.random.split(key, 5)
        x = jax.random.normal(kx, (B, Z), dtype=jnp.float32)
        # Deterministic parameter init in PyTorch layout: W is (out, in).
        w1 = jax.random.uniform(kw1, (H, Z), jnp.float32, -1.0, 1.0) / jnp.sqrt(Z)
        b1 = jax.random.uniform(kb1, (H,), jnp.float32, -1.0, 1.0) / jnp.sqrt(Z)
        w2 = jax.random.uniform(kw2, (O, H), jnp.float32, -1.0, 1.0) / jnp.sqrt(H)
        b2 = jax.random.uniform(kb2, (O,), jnp.float32, -1.0, 1.0) / jnp.sqrt(H)
        return x, w1, b1, w2, b2

    k1, k2 = jax.random.split(key)

    # Case 1: z_dim=8, hidden=32, output=64, B=10. Exercises: hidden/output
    # lane padding, multi-tile grid with a PARTIAL last batch block (no host
    # pad), and the post-call column slice path.
    x, w1, b1, w2, b2 = make_case(k1, Z=8, H=32, O=64, B=10)
    params = prepare_decoder_params(w1, b1, w2, b2)              # one-time prep
    out = jax.block_until_ready(decoder_forward(x, *params[:4], params[4],
                                                block_b=8))
    ref = reference_forward(x, w1, b1, w2, b2)
    assert out.shape == (10, 64)
    assert jnp.allclose(out, ref, atol=1e-5, rtol=1e-5), "case1 f32 mismatch"

    # Case 1b: same weights stored in bf16 (v6e/v7x recommendation);
    # f32 accumulation + f32 elementwise keeps the error small.
    params_bf16 = prepare_decoder_params(w1, b1, w2, b2, param_dtype=jnp.bfloat16)
    out_bf16 = jax.block_until_ready(decoder_forward(x, *params_bf16[:4],
                                                     params_bf16[4], block_b=8))
    assert out_bf16.shape == (10, 64)
    assert jnp.allclose(out_bf16, ref, atol=2e-2), "case1 bf16 mismatch"

    # Case 2: output_dim already a multiple of 128 -> no output padding and
    # no post-call slice (lane-dense fast path), full-tile batch blocks.
    x2, w1b, b1b, w2b, b2b = make_case(k2, Z=8, H=32, O=128, B=16)
    params2 = prepare_decoder_params(w1b, b1b, w2b, b2b)
    out2 = jax.block_until_ready(decoder_forward(x2, *params2[:4], params2[4]))
    ref2 = reference_forward(x2, w1b, b1b, w2b, b2b)
    assert out2.shape == (16, 128)
    assert jnp.allclose(out2, ref2, atol=1e-5, rtol=1e-5), "case2 f32 mismatch"

    print("KERNEL_OK")
</pallas_src>

<mosaic_0001>
module attributes {stable_mosaic.version = 11 : i64} {
  func.func @decoder_kernel(%arg0: i32, %arg1: memref<8x8xf32, #tpu.memory_space<vmem>>, %arg2: memref<8x128xf32, #tpu.memory_space<vmem>>, %arg3: memref<1x128xf32, #tpu.memory_space<vmem>>, %arg4: memref<128x128xf32, #tpu.memory_space<vmem>>, %arg5: memref<1x128xf32, #tpu.memory_space<vmem>>, %arg6: memref<8x128xf32, #tpu.memory_space<vmem>>) attributes {dimension_semantics = [#tpu.dimension_semantics<parallel>], iteration_bounds = array<i64: 2>, scalar_prefetch = 0 : i64, scratch_operands = 0 : i64, tpu.core_type = #tpu.core_type<tc>, window_params = [{transform_indices = @transform_0, window_bounds = array<i64: 8, 8>}, {pipeline_mode = #tpu.pipeline_mode<synchronous>, transform_indices = @transform_1, window_bounds = array<i64: 8, 128>}, {pipeline_mode = #tpu.pipeline_mode<synchronous>, transform_indices = @transform_2, window_bounds = array<i64: 1, 128>}, {pipeline_mode = #tpu.pipeline_mode<synchronous>, transform_indices = @transform_3, window_bounds = array<i64: 128, 128>}, {pipeline_mode = #tpu.pipeline_mode<synchronous>, transform_indices = @transform_4, window_bounds = array<i64: 1, 128>}, {transform_indices = @transform_5, window_bounds = array<i64: 8, 128>}]} {
    %c0 = arith.constant 0 : index
    %c0_0 = arith.constant 0 : index
    %0 = vector.load %arg1[%c0, %c0_0] : memref<8x8xf32, #tpu.memory_space<vmem>>, vector<8x8xf32>
    %c0_1 = arith.constant 0 : index
    %c0_2 = arith.constant 0 : index
    %1 = vector.load %arg2[%c0_1, %c0_2] : memref<8x128xf32, #tpu.memory_space<vmem>>, vector<8x128xf32>
    %cst = arith.constant dense<0.000000e+00> : vector<8x128xf32>
    %2 = tpu.matmul %0, %1, %cst {dimension_numbers = #tpu.dot_dimension_numbers<[1], [0], [0], [1], [0, 0, 1, 1], [], []>} : vector<8x8xf32>, vector<8x128xf32>, vector<8x128xf32> -> vector<8x128xf32>
    %c0_3 = arith.constant 0 : index
    %c0_4 = arith.constant 0 : index
    %3 = vector.load %arg3[%c0_3, %c0_4] : memref<1x128xf32, #tpu.memory_space<vmem>>, vector<1x128xf32>
    %4 = vector.broadcast %3 : vector<1x128xf32> to vector<8x128xf32>
    %5 = arith.addf %2, %4 : vector<8x128xf32>
    %cst_5 = arith.constant 0.000000e+00 : f32
    %6 = vector.broadcast %cst_5 : f32 to vector<8x128xf32>
    %7 = arith.maximumf %5, %6 : vector<8x128xf32>
    %c0_6 = arith.constant 0 : index
    %c0_7 = arith.constant 0 : index
    %8 = vector.load %arg4[%c0_6, %c0_7] : memref<128x128xf32, #tpu.memory_space<vmem>>, vector<128x128xf32>
    %cst_8 = arith.constant dense<0.000000e+00> : vector<8x128xf32>
    %9 = tpu.matmul %7, %8, %cst_8 {dimension_numbers = #tpu.dot_dimension_numbers<[1], [0], [0], [1], [0, 0, 1, 1], [], []>} : vector<8x128xf32>, vector<128x128xf32>, vector<8x128xf32> -> vector<8x128xf32>
    %c0_9 = arith.constant 0 : index
    %c0_10 = arith.constant 0 : index
    %10 = vector.load %arg5[%c0_9, %c0_10] : memref<1x128xf32, #tpu.memory_space<vmem>>, vector<1x128xf32>
    %11 = vector.broadcast %10 : vector<1x128xf32> to vector<8x128xf32>
    %12 = arith.addf %9, %11 : vector<8x128xf32>
    %13 = arith.negf %12 : vector<8x128xf32>
    %14 = math.exp %13 : vector<8x128xf32>
    %cst_11 = arith.constant 1.000000e+00 : f32
    %15 = vector.broadcast %cst_11 : f32 to vector<8x128xf32>
    %16 = arith.addf %15, %14 : vector<8x128xf32>
    %17 = arith.divf %15, %16 : vector<8x128xf32>
    %c0_12 = arith.constant 0 : index
    %c0_13 = arith.constant 0 : index
    %18 = vector.load %arg6[%c0_12, %c0_13] : memref<8x128xf32, #tpu.memory_space<vmem>>, vector<8x128xf32>
    tpu.vector_store %arg6[%c0_12, %c0_13], %17 {strides = array<i32>} : memref<8x128xf32, #tpu.memory_space<vmem>>, vector<8x128xf32>,
    return
  }
  func.func @transform_0(%arg0: i32) -> (i32, i32) {
    %c0_i32 = arith.constant 0 : i32
    %c0_i32_0 = arith.constant 0 : i32
    return %arg0, %c0_i32 : i32, i32
  }
  func.func @transform_1(%arg0: i32) -> (i32, i32) {
    %c0_i32 = arith.constant 0 : i32
    %c0_i32_0 = arith.constant 0 : i32
    %c0_i32_1 = arith.constant 0 : i32
    return %c0_i32, %c0_i32_0 : i32, i32
  }
  func.func @transform_2(%arg0: i32) -> (i32, i32) {
    %c0_i32 = arith.constant 0 : i32
    %c0_i32_0 = arith.constant 0 : i32
    %c0_i32_1 = arith.constant 0 : i32
    return %c0_i32, %c0_i32_0 : i32, i32
  }
  func.func @transform_3(%arg0: i32) -> (i32, i32) {
    %c0_i32 = arith.constant 0 : i32
    %c0_i32_0 = arith.constant 0 : i32
    %c0_i32_1 = arith.constant 0 : i32
    return %c0_i32, %c0_i32_0 : i32, i32
  }
  func.func @transform_4(%arg0: i32) -> (i32, i32) {
    %c0_i32 = arith.constant 0 : i32
    %c0_i32_0 = arith.constant 0 : i32
    %c0_i32_1 = arith.constant 0 : i32
    return %c0_i32, %c0_i32_0 : i32, i32
  }
  func.func @transform_5(%arg0: i32) -> (i32, i32) {
    %c0_i32 = arith.constant 0 : i32
    %c0_i32_0 = arith.constant 0 : i32
    return %arg0, %c0_i32 : i32, i32
  }
}

module attributes {stable_mosaic.version = 11 : i64} {
  func.func @decoder_kernel(%arg0: i32, %arg1: memref<8x8xf32, #tpu.memory_space<vmem>>, %arg2: memref<8x128xf32, #tpu.memory_space<vmem>>, %arg3: memref<1x128xf32, #tpu.memory_space<vmem>>, %arg4: memref<128x128xf32, #tpu.memory_space<vmem>>, %arg5: memref<1x128xf32, #tpu.memory_space<vmem>>, %arg6: memref<8x128xf32, #tpu.memory_space<vmem>>) attributes {dimension_semantics = [#tpu.dimension_semantics<parallel>], iteration_bounds = array<i64: 2>, scalar_prefetch = 0 : i64, scratch_operands = 0 : i64, tpu.core_type = #tpu.core_type<tc>, window_params = [{transform_indices = @transform_0, window_bounds = array<i64: 8, 8>}, {pipeline_mode = #tpu.pipeline_mode<synchronous>, transform_indices = @transform_1, window_bounds = array<i64: 8, 128>}, {pipeline_mode = #tpu.pipeline_mode<synchronous>, transform_indices = @transform_2, window_bounds = array<i64: 1, 128>}, {pipeline_mode = #tpu.pipeline_mode<synchronous>, transform_indices = @transform_3, window_bounds = array<i64: 128, 128>}, {pipeline_mode = #tpu.pipeline_mode<synchronous>, transform_indices = @transform_4, window_bounds = array<i64: 1, 128>}, {transform_indices = @transform_5, window_bounds = array<i64: 8, 128>}]} {
    %c0 = arith.constant 0 : index
    %c0_0 = arith.constant 0 : index
    %0 = vector.load %arg1[%c0, %c0_0] : memref<8x8xf32, #tpu.memory_space<vmem>>, vector<8x8xf32>
    %c0_1 = arith.constant 0 : index
    %c0_2 = arith.constant 0 : index
    %1 = vector.load %arg2[%c0_1, %c0_2] : memref<8x128xf32, #tpu.memory_space<vmem>>, vector<8x128xf32>
    %cst = arith.constant dense<0.000000e+00> : vector<8x128xf32>
    %2 = tpu.matmul %0, %1, %cst {dimension_numbers = #tpu.dot_dimension_numbers<[1], [0], [0], [1], [0, 0, 1, 1], [], []>} : vector<8x8xf32>, vector<8x128xf32>, vector<8x128xf32> -> vector<8x128xf32>
    %c0_3 = arith.constant 0 : index
    %c0_4 = arith.constant 0 : index
    %3 = vector.load %arg3[%c0_3, %c0_4] : memref<1x128xf32, #tpu.memory_space<vmem>>, vector<1x128xf32>
    %4 = vector.broadcast %3 : vector<1x128xf32> to vector<8x128xf32>
    %5 = arith.addf %2, %4 : vector<8x128xf32>
    %cst_5 = arith.constant 0.000000e+00 : f32
    %6 = vector.broadcast %cst_5 : f32 to vector<8x128xf32>
    %7 = arith.maximumf %5, %6 : vector<8x128xf32>
    %c0_6 = arith.constant 0 : index
    %c0_7 = arith.constant 0 : index
    %8 = vector.load %arg4[%c0_6, %c0_7] : memref<128x128xf32, #tpu.memory_space<vmem>>, vector<128x128xf32>
    %cst_8 = arith.constant dense<0.000000e+00> : vector<8x128xf32>
    %9 = tpu.matmul %7, %8, %cst_8 {dimension_numbers = #tpu.dot_dimension_numbers<[1], [0], [0], [1], [0, 0, 1, 1], [], []>} : vector<8x128xf32>, vector<128x128xf32>, vector<8x128xf32> -> vector<8x128xf32>
    %c0_9 = arith.constant 0 : index
    %c0_10 = arith.constant 0 : index
    %10 = vector.load %arg5[%c0_9, %c0_10] : memref<1x128xf32, #tpu.memory_space<vmem>>, vector<1x128xf32>
    %11 = vector.broadcast %10 : vector<1x128xf32> to vector<8x128xf32>
    %12 = arith.addf %9, %11 : vector<8x128xf32>
    %13 = arith.negf %12 : vector<8x128xf32>
    %14 = math.exp %13 : vector<8x128xf32>
    %cst_11 = arith.constant 1.000000e+00 : f32
    %15 = vector.broadcast %cst_11 : f32 to vector<8x128xf32>
    %16 = arith.addf %15, %14 : vector<8x128xf32>
    %17 = arith.divf %15, %16 : vector<8x128xf32>
    %c0_12 = arith.constant 0 : index
    %c0_13 = arith.constant 0 : index
    %18 = vector.load %arg6[%c0_12, %c0_13] : memref<8x128xf32, #tpu.memory_space<vmem>>, vector<8x128xf32>
    tpu.vector_store %arg6[%c0_12, %c0_13], %17 {strides = array<i32>} : memref<8x128xf32, #tpu.memory_space<vmem>>, vector<8x128xf32>,
    return
  }
  func.func @transform_0(%arg0: i32) -> (i32, i32) {
    %c0_i32 = arith.constant 0 : i32
    %c0_i32_0 = arith.constant 0 : i32
    return %arg0, %c0_i32 : i32, i32
  }
  func.func @transform_1(%arg0: i32) -> (i32, i32) {
    %c0_i32 = arith.constant 0 : i32
    %c0_i32_0 = arith.constant 0 : i32
    %c0_i32_1 = arith.constant 0 : i32
    return %c0_i32, %c0_i32_0 : i32, i32
  }
  func.func @transform_2(%arg0: i32) -> (i32, i32) {
    %c0_i32 = arith.constant 0 : i32
    %c0_i32_0 = arith.constant 0 : i32
    %c0_i32_1 = arith.constant 0 : i32
    return %c0_i32, %c0_i32_0 : i32, i32
  }
  func.func @transform_3(%arg0: i32) -> (i32, i32) {
    %c0_i32 = arith.constant 0 : i32
    %c0_i32_0 = arith.constant 0 : i32
    %c0_i32_1 = arith.constant 0 : i32
    return %c0_i32, %c0_i32_0 : i32, i32
  }
  func.func @transform_4(%arg0: i32) -> (i32, i32) {
    %c0_i32 = arith.constant 0 : i32
    %c0_i32_0 = arith.constant 0 : i32
    %c0_i32_1 = arith.constant 0 : i32
    return %c0_i32, %c0_i32_0 : i32, i32
  }
  func.func @transform_5(%arg0: i32) -> (i32, i32) {
    %c0_i32 = arith.constant 0 : i32
    %c0_i32_0 = arith.constant 0 : i32
    return %arg0, %c0_i32 : i32, i32
  }
}

</mosaic_0001>

<bundles_post_ra>
// kernel: tpu_custom_call.1
= control target key start
LH: loop header
LB: loop body
LE: loop exit
PB: predicated region body
PF: predicated region fallthrough
CT: control target
= control target key end

     0   :  { %10 = vsyncpa [#allocation3], 0  ;;  %s722_s0 = inlined_call_operand.vmem [shape: f32[10,8], index: 0, kind: input, shape index: {}]   ;;  %s723_s1 = inlined_call_operand.vmem [shape: f32[8,128], index: 1, kind: input, shape index: {}]   ;;  %s724_s2 = inlined_call_operand.vmem [shape: f32[1,128], index: 2, kind: input, shape index: {}]   ;;  %s725_s3 = inlined_call_operand.hbm [shape: f32[128,128], index: 3, kind: input, shape index: {}]   ;;  %s726_s4 = inlined_call_operand.vmem [shape: f32[1,128], index: 4, kind: input, shape index: {}]   ;;  %s727_s5 = inlined_call_operand.hbm [shape: f32[10,128], index: 5, kind: output, shape index: {}]  }
   0x1   :  { %11 = vsyncpa [#allocation4], 0 }
   0x2   :  { %13 = vsyncpa [#allocation4 + $0x1], 0  ;;  %s618_s18 = smov 0   ;;  %s620_s19 = smov 0  }
   0x3   :  { %s622_s20 = smov 0   ;;  %s624_s21 = smov 0  }
   0x4 LB: > { %s639_s22 = sadd.s32 4294967295, %s583_s21   ;;  %s415_s23 = sadd.s32 4294967294, %s583_s21   ;;  %s583_s21 = sphi %s624_s21, %s733_s21   ;;  %s579_s20 = sphi %s622_s20, %s732_s20   ;;  %s575_s19 = sphi %s620_s19, %s731_s19   ;;  %s571_s18 = sphi %s618_s18, %s730_s18  }
   0x5   : > { %s643_s24 = sadd.s32 1, %s583_s21   ;;  %s136_s25 = sadd.s32 1, %s579_s20 }
   0x6   : > { %s133_s26 = ssub.s32 %s583_s21, %s643_s24  ;;  %p146_p0 = scmp.ne.s32.totalorder %s579_s20, %s575_s19 }
   0x7   : > { %p134_p1 = scmp.eq.s32.totalorder %s133_s26, 0  ;;  %p147_p2 = scmp.eq.s32.totalorder %s639_s22, 1 }
   0x8   : > { %p152_p3 = scmp.ne.s32.totalorder %s575_s19, %s571_s18  ;;  %p153_p4 = scmp.eq.s32.totalorder %s415_s23, 1 }
   0x9   : > { %s654_s27 = scalar_select %p134_p1, %s579_s20, %s136_s25  }
   0xa   : > { %p656_p5 = por %p147_p2, %p146_p0  ;;  %p660_p6 = por %p153_p4, %p152_p3 }
   0xb   : > { %p416_p7 = scmp.ge.s32.totalorder %s583_s21, 1  ;;  %p160_p8 = scmp.lt.s32.totalorder %s583_s21, 3 }
   0xc   : > { %p443_p9 = scmp.eq.s32.totalorder %s639_s22, 0  ;;  %s177_s7 = sshll.u32 %s725_s3, 4  ;;  %s178_s7 = int_to_ptr.hbm [resolvable:$true] %s177_s7 }
   0xd   : > { %p161_p10 = pnand %p416_p7, %p160_p8  ;;  %s585_s8 = smov [#allocation2]  }
   0xe   : > { %s179_s9 = sshll.u32 %s585_s8, 4  ;;  %s586_s10 = smov 128   ;;  %s180_s9 = int_to_ptr.vmem [resolvable:$true] %s179_s9 }
   0xf   : > { %p435_p11 = pneg %p161_p10  ;;  %s587_s11 = smov 8  }
  0x10   : > { %205 = sbr.rel (%p161_p10) target bundleno = 318 (0x13e), region = 40 }
  0x11   : > { %p436_p12 = pnand %p443_p9, %p435_p11 }
  0x13   : > { %438 = dma.hbm_to_vmem [thread:$0]  (!%p436_p12), %s178_s7, 2048, %s180_s9, [#allocation3], %s586_s10, %s586_s10, %s587_s11  }
  0x15   : > { %562 = dma.done.wait (%p443_p9), [#allocation3], 2048  }
  0x16   : > { %564 = vsyncadd (%p443_p9), [#allocation3], 4294965248  ;;  %p233_p13 = scmp.lt.s32.totalorder %s639_s22, 1  ;;  %vm243_vm0 = vcmask 64512   ;;  %v238_v0 = vld [vmem:[%s723_s1] sm:$0xff]  ;;  %v283_v2 = vld [vmem:[#allocation2 + $0x78] sm:$0xff] }
  0x17   : > { %262 = vmatpush.msra.mxu0 %v238_v0  ;;  %288 = vmatpush.msra.mxu1 %v283_v2  ;;  %v282_v3 = vld [vmem:[#allocation2 + $0x70] sm:$0xff]  ;;  %v281_v4 = vld [vmem:[#allocation2 + $0x68] sm:$0xff]  ;;  %v280_v5 = vld [vmem:[#allocation2 + $0x60] sm:$0xff]  ;;  %s230_s7 = sand.u32 1, %s575_s19   ;;  %s426_s9 = sshll.u32 %s639_s22, 3 }
  0x18   : > { %s234_s12 = scalar_select %p233_p13, %s639_s22, 1  ;;  %v279_v6 = vld [vmem:[#allocation2 + $0x58] sm:$0xff]  ;;  %v278_v7 = vld [vmem:[#allocation2 + $0x50] sm:$0xff]  ;;  %v277_v8 = vld [vmem:[#allocation2 + $0x48] sm:$0xff] }
  0x19   : > { %289 = vmatpush.msra.mxu1 %v282_v3  ;;  %v276_v9 = vld [vmem:[#allocation2 + $0x40] sm:$0xff]  ;;  %v275_v10 = vld [vmem:[#allocation2 + $0x38] sm:$0xff]  ;;  %v274_v11 = vld [vmem:[#allocation2 + $0x30] sm:$0xff]  ;;  %s421_s8 = sshll.u32 %s230_s7, 3  ;;  %s329_s22 = scalar_lea.sflag [#allocation4], %s230_s7 }
  0x1a   : > { %s422_s13 = sshll.u32 %s234_s12, 3  ;;  %v273_v12 = vld [vmem:[#allocation2 + $0x28] sm:$0xff]  ;;  %v272_v13 = vld [vmem:[#allocation2 + $0x20] sm:$0xff]  ;;  %v271_v14 = vld [vmem:[#allocation2 + $0x18] sm:$0xff]  ;;  %s339_s12 = scalar_lea.hbm %s727_s5, %s426_s9 }
  0x1b   : > { %s236_s16 = scalar_lea.vmem %s722_s0, %s422_s13  ;;  %290 = vmatpush.msra.mxu1 %v281_v4  ;;  %v270_v15 = vld [vmem:[#allocation2 + $0x10] sm:$0xff]  ;;  %v269_v16 = vld [vmem:[#allocation2 + $0x8] sm:$0xff]  ;;  %v268_v17 = vld [vmem:[#allocation2] sm:$0xff]  ;;  %s232_s13 = scalar_lea.vmem [#allocation5], %s421_s8 }
  0x1c   : > { %v237_v1 = vld [vmem:[%s236_s16] sm:$0xff]  ;;  %s341_s14 = sshll.u32 %s232_s13, 4  ;;  %s343_s15 = sshll.u32 %s339_s12, 4  ;;  %s342_s14 = int_to_ptr.vmem [resolvable:$true] %s341_s14  ;;  %s344_s15 = int_to_ptr.hbm [resolvable:$true] %s343_s15 }
  0x1d   : > { %423 = vmatmul.msk.f32.vlgmr.msra.gmra.mxu0 %vm243_vm0, %v237_v1  ;;  %291 = vmatpush.msra.mxu1 %v280_v5  ;;  %v481_v18 = vld [vmem:[%s724_s2] ss:$0 sm:$0xff]  ;;  %s531_s16 = sshra.s32 %s344_s15, 4  ;;  %s537_s26 = scalar_lea.hbm %s727_s5, 16  ;;  %s532_s16 = int_to_ptr.hbm [resolvable:$true] %s531_s16 }
  0x1e   : > { %v482_v22 = vld [vmem:[%s726_s4] ss:$0 sm:$0xff]  ;;  %s533_s17 = scalar_lea.hbm %s532_s16, 8  ;;  %p538_p3 = scmp.lt.s32.totalorder %s532_s16, %s727_s5 }
  0x1f   : > { %292 = vmatpush.msra.mxu1 %v279_v6  ;;  %p534_p0 = scmp.ne.s32.totalorder %s532_s16, %s533_s17  ;;  %p539_p4 = scmp.lt.s32.totalorder %s537_s26, %s533_s17 }
  0x21   : > { %293 = vmatpush.msra.mxu1 %v278_v7  ;;  %p535_p1 = pnand %p534_p0, %p656_p5  ;;  %p540_p7 = por %p539_p4, %p538_p3 }
  0x23   : > { %294 = vmatpush.msra.mxu1 %v277_v8  ;;  %p536_p2 = pneg %p535_p1 }
  0x25   : > { %295 = vmatpush.msra.mxu1 %v276_v9  ;;  %p541_p8 = pnand %p540_p7, %p536_p2 }
  0x27   : > { %296 = vmatpush.msra.mxu1 %v275_v10 }
  0x29   : > { %297 = vmatpush.msra.mxu1 %v274_v11 }
  0x2b   : > { %298 = vmatpush.msra.mxu1 %v273_v12 }
  0x2d   : > { %299 = vmatpush.msra.mxu1 %v272_v13 }
  0x2f   : > { %300 = vmatpush.msra.mxu1 %v271_v14 }
  0x31   : > { %301 = vmatpush.msra.mxu1 %v270_v15 }
  0x33   : > { %302 = vmatpush.msra.mxu1 %v269_v16 }
  0x35   : > { %303 = vmatpush.msra.mxu1 %v268_v17 }
  0x9a   : > { %v264_v19 = vpop.f32.mrf.mxu0 }
  0x9b   : > { %v265_v20 = vadd.f32 %v481_v18, %v264_v19 }
  0x9d   : > { %v267_v21 = vmax.f32 %v265_v20, 0.0 }
  0x9f   : > { %304 = vmatmul.f32.vlgmr.msra.gmra.mxu1 %v267_v21 }
 0x11c   : > { %v305_v23 = vpop.f32.mrf.mxu1 }
 0x11d   : > { %v306_v24 = vadd.f32 %v482_v22, %v305_v23 }
 0x11f   : > { %v424_v25 = vmul.f32 -1.442695, %v306_v24 }
 0x121   : > { %483 = vpow2.f32 %v424_v25 }
 0x127   : > { %v484_v26 = vpop.eup %483 }
 0x128   : > { %v311_v27 = vadd.f32 1.0, %v484_v26 }
 0x12a   : > { %485 = vrcp.f32 %v311_v27  ;;  %v323_v31 = vand.u32 2147483648, %v311_v27  ;;  %v321_v33 = vand.u32 2147483647, %v311_v27  ;;  %vm317_vm2 = vweird.f32 %v311_v27 }
 0x12c   : > { %v324_v35 = vor.u32 1.1754944e-38, %v323_v31  ;;  %vm322_vm4 = vcmp.eq.f32.partialorder %v321_v33, 8.507059e+37 }
 0x130   : > { %v486_v28 = vpop.eup %485 }
 0x131   : > { %v313_v29 = vmul.f32 %v486_v28, %v311_v27  ;;  %vm318_vm1 = vweird.f32 %v486_v28 }
 0x132   : > { %vm319_vm3 = vmor %vm317_vm2, %vm318_vm1 }
 0x133   : > { %v314_v30 = vsub.f32 1.0, %v313_v29 }
 0x135   : > { %v315_v32 = vmul.f32 %v486_v28, %v314_v30 }
 0x137   : > { %v316_v34 = vadd.f32 %v486_v28, %v315_v32 }
 0x139   : > { %v320_v36 = vsel %vm319_vm3, %v486_v28, %v316_v34 }
 0x13a   : > { %v325_v37 = vsel %vm322_vm4, %v324_v35, %v320_v36 }
 0x13b   : > { %327 = vst [vmem:[%s232_s13] sm:$0xff] %v325_v37 }
 0x13c   : > { %544 = shalt.err (!%p541_p8)
}
 0x13d   : > { %433 = dma.vmem_to_hbm [thread:$0]  (%p656_p5), %s342_s14, 128, %s344_s15, %s329_s22  }
 0x13e PF: > { %p445_p9 = scmp.ge.s32.totalorder %s583_s21, 2  ;;  %s355_s7 = sand.u32 1, %s571_s18  }
 0x13f   : > { %s356_s8 = scalar_lea.sflag [#allocation4], %s355_s7 }
 0x140   : > { %p440_p10 = pnand %p445_p9, %p660_p6 }
 0x142   : > { %p441_p11 = pneg %p440_p10 }
 0x144   : > { %566 = dma.done.wait (%p441_p11), %s356_s8, 128  }
 0x145   : > { %568 = vsyncadd (%p441_p11), %s356_s8, 4294967168  ;;  %p16_p12 = scmp.ge.s32.totalorder %s643_s24, 4   ;;  %s730_s18 = smov %s575_s19 }
 0x146   : > { %s731_s19 = smov %s579_s20  ;;  %s732_s20 = smov %s654_s27 }
 0x147   : > { %s733_s21 = smov %s643_s24  ;;  %18 = sbr.rel (!%p16_p12) target bundleno = 4 (0x4), region = 80 }
 0x14c   :  { %362 = vsyncpa [#allocation3], 1 }
 0x14d   :  { %364 = vsyncpa [#allocation3 + $0x1], 1 }
 0x14e   :  { %365 = vsyncpa [#allocation4], 1 }
 0x14f   :  { %367 = vsyncpa [#allocation4 + $0x1], 1 }

// kernel: tpu_custom_call.1
= control target key start
LH: loop header
LB: loop body
LE: loop exit
PB: predicated region body
PF: predicated region fallthrough
CT: control target
= control target key end

     0   :  { %10 = vsyncpa [#allocation3], 0  ;;  %s722_s0 = inlined_call_operand.vmem [shape: f32[10,8], index: 0, kind: input, shape index: {}]   ;;  %s723_s1 = inlined_call_operand.vmem [shape: f32[8,128], index: 1, kind: input, shape index: {}]   ;;  %s724_s2 = inlined_call_operand.vmem [shape: f32[1,128], index: 2, kind: input, shape index: {}]   ;;  %s725_s3 = inlined_call_operand.hbm [shape: f32[128,128], index: 3, kind: input, shape index: {}]   ;;  %s726_s4 = inlined_call_operand.vmem [shape: f32[1,128], index: 4, kind: input, shape index: {}]   ;;  %s727_s5 = inlined_call_operand.hbm [shape: f32[10,128], index: 5, kind: output, shape index: {}]  }
   0x1   :  { %11 = vsyncpa [#allocation4], 0 }
   0x2   :  { %13 = vsyncpa [#allocation4 + $0x1], 0  ;;  %s618_s18 = smov 0   ;;  %s620_s19 = smov 0  }
   0x3   :  { %s622_s20 = smov 0   ;;  %s624_s21 = smov 0  }
   0x4 LB: > { %s639_s22 = sadd.s32 4294967295, %s583_s21   ;;  %s415_s23 = sadd.s32 4294967294, %s583_s21   ;;  %s583_s21 = sphi %s624_s21, %s733_s21   ;;  %s579_s20 = sphi %s622_s20, %s732_s20   ;;  %s575_s19 = sphi %s620_s19, %s731_s19   ;;  %s571_s18 = sphi %s618_s18, %s730_s18  }
   0x5   : > { %s643_s24 = sadd.s32 1, %s583_s21   ;;  %s136_s25 = sadd.s32 1, %s579_s20 }
   0x6   : > { %s133_s26 = ssub.s32 %s583_s21, %s643_s24  ;;  %p146_p0 = scmp.ne.s32.totalorder %s579_s20, %s575_s19 }
   0x7   : > { %p134_p1 = scmp.eq.s32.totalorder %s133_s26, 0  ;;  %p147_p2 = scmp.eq.s32.totalorder %s639_s22, 1 }
   0x8   : > { %p152_p3 = scmp.ne.s32.totalorder %s575_s19, %s571_s18  ;;  %p153_p4 = scmp.eq.s32.totalorder %s415_s23, 1 }
   0x9   : > { %s654_s27 = scalar_select %p134_p1, %s579_s20, %s136_s25  }
   0xa   : > { %p656_p5 = por %p147_p2, %p146_p0  ;;  %p660_p6 = por %p153_p4, %p152_p3 }
   0xb   : > { %p416_p7 = scmp.ge.s32.totalorder %s583_s21, 1  ;;  %p160_p8 = scmp.lt.s32.totalorder %s583_s21, 3 }
   0xc   : > { %p443_p9 = scmp.eq.s32.totalorder %s639_s22, 0  ;;  %s177_s7 = sshll.u32 %s725_s3, 4  ;;  %s178_s7 = int_to_ptr.hbm [resolvable:$true] %s177_s7 }
   0xd   : > { %p161_p10 = pnand %p416_p7, %p160_p8  ;;  %s585_s8 = smov [#allocation2]  }
   0xe   : > { %s179_s9 = sshll.u32 %s585_s8, 4  ;;  %s586_s10 = smov 128   ;;  %s180_s9 = int_to_ptr.vmem [resolvable:$true] %s179_s9 }
   0xf   : > { %p435_p11 = pneg %p161_p10  ;;  %s587_s11 = smov 8  }
  0x10   : > { %205 = sbr.rel (%p161_p10) target bundleno = 318 (0x13e), region = 40 }
  0x11   : > { %p436_p12 = pnand %p443_p9, %p435_p11 }
  0x13   : > { %438 = dma.hbm_to_vmem [thread:$0]  (!%p436_p12), %s178_s7, 2048, %s180_s9, [#allocation3], %s586_s10, %s586_s10, %s587_s11  }
  0x15   : > { %562 = dma.done.wait (%p443_p9), [#allocation3], 2048  }
  0x16   : > { %564 = vsyncadd (%p443_p9), [#allocation3], 4294965248  ;;  %p233_p13 = scmp.lt.s32.totalorder %s639_s22, 1  ;;  %vm243_vm0 = vcmask 64512   ;;  %v238_v0 = vld [vmem:[%s723_s1] sm:$0xff]  ;;  %v283_v2 = vld [vmem:[#allocation2 + $0x78] sm:$0xff] }
  0x17   : > { %262 = vmatpush.msra.mxu0 %v238_v0  ;;  %288 = vmatpush.msra.mxu1 %v283_v2  ;;  %v282_v3 = vld [vmem:[#allocation2 + $0x70] sm:$0xff]  ;;  %v281_v4 = vld [vmem:[#allocation2 + $0x68] sm:$0xff]  ;;  %v280_v5 = vld [vmem:[#allocation2 + $0x60] sm:$0xff]  ;;  %s230_s7 = sand.u32 1, %s575_s19   ;;  %s426_s9 = sshll.u32 %s639_s22, 3 }
  0x18   : > { %s234_s12 = scalar_select %p233_p13, %s639_s22, 1  ;;  %v279_v6 = vld [vmem:[#allocation2 + $0x58] sm:$0xff]  ;;  %v278_v7 = vld [vmem:[#allocation2 + $0x50] sm:$0xff]  ;;  %v277_v8 = vld [vmem:[#allocation2 + $0x48] sm:$0xff] }
  0x19   : > { %289 = vmatpush.msra.mxu1 %v282_v3  ;;  %v276_v9 = vld [vmem:[#allocation2 + $0x40] sm:$0xff]  ;;  %v275_v10 = vld [vmem:[#allocation2 + $0x38] sm:$0xff]  ;;  %v274_v11 = vld [vmem:[#allocation2 + $0x30] sm:$0xff]  ;;  %s421_s8 = sshll.u32 %s230_s7, 3  ;;  %s329_s22 = scalar_lea.sflag [#allocation4], %s230_s7 }
  0x1a   : > { %s422_s13 = sshll.u32 %s234_s12, 3  ;;  %v273_v12 = vld [vmem:[#allocation2 + $0x28] sm:$0xff]  ;;  %v272_v13 = vld [vmem:[#allocation2 + $0x20] sm:$0xff]  ;;  %v271_v14 = vld [vmem:[#allocation2 + $0x18] sm:$0xff]  ;;  %s339_s12 = scalar_lea.hbm %s727_s5, %s426_s9 }
  0x1b   : > { %s236_s16 = scalar_lea.vmem %s722_s0, %s422_s13  ;;  %290 = vmatpush.msra.mxu1 %v281_v4  ;;  %v270_v15 = vld [vmem:[#allocation2 + $0x10] sm:$0xff]  ;;  %v269_v16 = vld [vmem:[#allocation2 + $0x8] sm:$0xff]  ;;  %v268_v17 = vld [vmem:[#allocation2] sm:$0xff]  ;;  %s232_s13 = scalar_lea.vmem [#allocation5], %s421_s8 }
  0x1c   : > { %v237_v1 = vld [vmem:[%s236_s16] sm:$0xff]  ;;  %s341_s14 = sshll.u32 %s232_s13, 4  ;;  %s343_s15 = sshll.u32 %s339_s12, 4  ;;  %s342_s14 = int_to_ptr.vmem [resolvable:$true] %s341_s14  ;;  %s344_s15 = int_to_ptr.hbm [resolvable:$true] %s343_s15 }
  0x1d   : > { %423 = vmatmul.msk.f32.vlgmr.msra.gmra.mxu0 %vm243_vm0, %v237_v1  ;;  %291 = vmatpush.msra.mxu1 %v280_v5  ;;  %v481_v18 = vld [vmem:[%s724_s2] ss:$0 sm:$0xff]  ;;  %s531_s16 = sshra.s32 %s344_s15, 4  ;;  %s537_s26 = scalar_lea.hbm %s727_s5, 16  ;;  %s532_s16 = int_to_ptr.hbm [resolvable:$true] %s531_s16 }
  0x1e   : > { %v482_v22 = vld [vmem:[%s726_s4] ss:$0 sm:$0xff]  ;;  %s533_s17 = scalar_lea.hbm %s532_s16, 8  ;;  %p538_p3 = scmp.lt.s32.totalorder %s532_s16, %s727_s5 }
  0x1f   : > { %292 = vmatpush.msra.mxu1 %v279_v6  ;;  %p534_p0 = scmp.ne.s32.totalorder %s532_s16, %s533_s17  ;;  %p539_p4 = scmp.lt.s32.totalorder %s537_s26, %s533_s17 }
  0x21   : > { %293 = vmatpush.msra.mxu1 %v278_v7  ;;  %p535_p1 = pnand %p534_p0, %p656_p5  ;;  %p540_p7 = por %p539_p4, %p538_p3 }
  0x23   : > { %294 = vmatpush.msra.mxu1 %v277_v8  ;;  %p536_p2 = pneg %p535_p1 }
  0x25   : > { %295 = vmatpush.msra.mxu1 %v276_v9  ;;  %p541_p8 = pnand %p540_p7, %p536_p2 }
  0x27   : > { %296 = vmatpush.msra.mxu1 %v275_v10 }
  0x29   : > { %297 = vmatpush.msra.mxu1 %v274_v11 }
  0x2b   : > { %298 = vmatpush.msra.mxu1 %v273_v12 }
  0x2d   : > { %299 = vmatpush.msra.mxu1 %v272_v13 }
  0x2f   : > { %300 = vmatpush.msra.mxu1 %v271_v14 }
  0x31   : > { %301 = vmatpush.msra.mxu1 %v270_v15 }
  0x33   : > { %302 = vmatpush.msra.mxu1 %v269_v16 }
  0x35   : > { %303 = vmatpush.msra.mxu1 %v268_v17 }
  0x9a   : > { %v264_v19 = vpop.f32.mrf.mxu0 }
  0x9b   : > { %v265_v20 = vadd.f32 %v481_v18, %v264_v19 }
  0x9d   : > { %v267_v21 = vmax.f32 %v265_v20, 0.0 }
  0x9f   : > { %304 = vmatmul.f32.vlgmr.msra.gmra.mxu1 %v267_v21 }
 0x11c   : > { %v305_v23 = vpop.f32.mrf.mxu1 }
 0x11d   : > { %v306_v24 = vadd.f32 %v482_v22, %v305_v23 }
 0x11f   : > { %v424_v25 = vmul.f32 -1.442695, %v306_v24 }
 0x121   : > { %483 = vpow2.f32 %v424_v25 }
 0x127   : > { %v484_v26 = vpop.eup %483 }
 0x128   : > { %v311_v27 = vadd.f32 1.0, %v484_v26 }
 0x12a   : > { %485 = vrcp.f32 %v311_v27  ;;  %v323_v31 = vand.u32 2147483648, %v311_v27  ;;  %v321_v33 = vand.u32 2147483647, %v311_v27  ;;  %vm317_vm2 = vweird.f32 %v311_v27 }
 0x12c   : > { %v324_v35 = vor.u32 1.1754944e-38, %v323_v31  ;;  %vm322_vm4 = vcmp.eq.f32.partialorder %v321_v33, 8.507059e+37 }
 0x130   : > { %v486_v28 = vpop.eup %485 }
 0x131   : > { %v313_v29 = vmul.f32 %v486_v28, %v311_v27  ;;  %vm318_vm1 = vweird.f32 %v486_v28 }
 0x132   : > { %vm319_vm3 = vmor %vm317_vm2, %vm318_vm1 }
 0x133   : > { %v314_v30 = vsub.f32 1.0, %v313_v29 }
 0x135   : > { %v315_v32 = vmul.f32 %v486_v28, %v314_v30 }
 0x137   : > { %v316_v34 = vadd.f32 %v486_v28, %v315_v32 }
 0x139   : > { %v320_v36 = vsel %vm319_vm3, %v486_v28, %v316_v34 }
 0x13a   : > { %v325_v37 = vsel %vm322_vm4, %v324_v35, %v320_v36 }
 0x13b   : > { %327 = vst [vmem:[%s232_s13] sm:$0xff] %v325_v37 }
 0x13c   : > { %544 = shalt.err (!%p541_p8)
}
 0x13d   : > { %433 = dma.vmem_to_hbm [thread:$0]  (%p656_p5), %s342_s14, 128, %s344_s15, %s329_s22  }
 0x13e PF: > { %p445_p9 = scmp.ge.s32.totalorder %s583_s21, 2  ;;  %s355_s7 = sand.u32 1, %s571_s18  }
 0x13f   : > { %s356_s8 = scalar_lea.sflag [#allocation4], %s355_s7 }
 0x140   : > { %p440_p10 = pnand %p445_p9, %p660_p6 }
 0x142   : > { %p441_p11 = pneg %p440_p10 }
 0x144   : > { %566 = dma.done.wait (%p441_p11), %s356_s8, 128  }
 0x145   : > { %568 = vsyncadd (%p441_p11), %s356_s8, 4294967168  ;;  %p16_p12 = scmp.ge.s32.totalorder %s643_s24, 4   ;;  %s730_s18 = smov %s575_s19 }
 0x146   : > { %s731_s19 = smov %s579_s20  ;;  %s732_s20 = smov %s654_s27 }
 0x147   : > { %s733_s21 = smov %s643_s24  ;;  %18 = sbr.rel (!%p16_p12) target bundleno = 4 (0x4), region = 80 }
 0x14c   :  { %362 = vsyncpa [#allocation3], 1 }
 0x14d   :  { %364 = vsyncpa [#allocation3 + $0x1], 1 }
 0x14e   :  { %365 = vsyncpa [#allocation4], 1 }
 0x14f   :  { %367 = vsyncpa [#allocation4 + $0x1], 1 }

</bundles_post_ra>
